<compile_context>
chip_gen: v7x
topology: tpu7x:2x2x1
jax: 0.10.0
libtpu: 0.0.40
codegen_flags: <defaults>
</compile_context>

<pallas_src>
import functools

import jax
import jax.numpy as jnp
import numpy as np
from jax.experimental import pallas as pl
from jax.experimental.pallas import tpu as pltpu


def _round_up(x, m):
    return ((x + m - 1) // m) * m


def mlp_kernel(*refs, num_layers):
    """Fused MLP. refs = (x, w0, b0, w1, b1, ..., w_{L-1}, b_{L-1}, out)."""
    x_ref = refs[0]
    o_ref = refs[-1]
    wb = refs[1:-1]

    h = x_ref[...]                                           # (BB, D0), matmul dtype
    for i in range(num_layers):
        w = wb[2 * i][...]                                   # (D_in, D_out), bf16/f32
        b = wb[2 * i + 1][...]                               # (1, D_out), f32
        h = jnp.dot(h.astype(w.dtype), w,
                    preferred_element_type=jnp.float32) + b  # f32 accumulate
        if i < num_layers - 1:                               # default act = nn.ReLU()
            h = jnp.maximum(h, 0.0)
    o_ref[...] = h.astype(o_ref.dtype)
    # TODO(synk): only the default act (nn.ReLU) is implemented; arbitrary `act`
    # modules passed to MLP(dims, act=...) are not supported here.


def mlp_forward(x, params, *, use_bf16_matmul=True, vmem_budget_bytes=48 << 20):
    """x: (B, dims[0]) f32.  params: list of (W^T (in,out), b (1,out)) per Linear."""
    B, D0 = x.shape
    num_layers = len(params)
    D_out = params[-1][0].shape[1]
    matmul_dtype = jnp.bfloat16 if use_bf16_matmul else jnp.float32

    # --- param prep: cast weights once in the wrapper; pad last layer to lane-dense N.
    D_out_p = max(_round_up(D_out, 128), 128)
    prepped = []
    for i, (w, b) in enumerate(params):
        if i == num_layers - 1 and D_out_p != D_out:
            w = jnp.pad(w, ((0, 0), (0, D_out_p - D_out)))
            b = jnp.pad(b, ((0, 0), (0, D_out_p - D_out)))
        prepped.append((w.astype(matmul_dtype), b.astype(jnp.float32)))

    wbytes = sum(w.size * w.dtype.itemsize + b.size * b.dtype.itemsize
                 for w, b in prepped)
    widest = max([D0] + [w.shape[1] for w, _ in prepped])
    x_itemsize = 2 if use_bf16_matmul else 4

    def _act_bytes(bb):
        # double-buffered x block + double-buffered out block + widest live activation
        return 2 * bb * D0 * x_itemsize + 2 * bb * D_out_p * 4 + bb * widest * 4

    # --- block-row selection: >= 2 grid steps (v7x megacore), multiple of 8, <= 512,
    # shrunk until the VMEM budget (safe for v7x's 64 MiB) is met.
    BB = min(512, max(8, _round_up(-(-B // 2), 8)))
    while BB > 8 and wbytes + _act_bytes(BB) > vmem_budget_bytes:
        BB = max(8, _round_up(BB // 2, 8))
    # TODO(synk): if resident weights alone exceed the VMEM budget (very large dims),
    # tile the largest layer over an extra "arbitrary" grid axis instead.

    Bp = _round_up(B, BB)
    xk = x.astype(matmul_dtype)
    if Bp != B:
        xk = jnp.pad(xk, ((0, Bp - B), (0, 0)))
    grid = (Bp // BB,)

    # --- specs: x blocked over rows; weights/biases VMEM-resident, single-buffered.
    def _const_spec(shape):
        return pl.BlockSpec(shape, lambda i: (0, 0), pipeline_mode=pl.Buffered(1))

    in_specs = [pl.BlockSpec((BB, D0), lambda i: (i, 0))]
    args = [xk]
    for w, b in prepped:
        in_specs.append(_const_spec(w.shape))
        in_specs.append(_const_spec(b.shape))
        args += [w, b]

    flops = 2 * Bp * sum(w.shape[0] * w.shape[1] for w, _ in prepped)
    bytes_accessed = xk.size * xk.dtype.itemsize + wbytes + Bp * D_out_p * 4
    cost = pl.CostEstimate(flops=flops, transcendentals=0,
                           bytes_accessed=bytes_accessed)

    vmem_needed = wbytes + _act_bytes(BB)
    vmem_limit = int(min(64 << 20, max(vmem_needed + (4 << 20), 32 << 20)))

    out = pl.pallas_call(
        functools.partial(mlp_kernel, num_layers=num_layers),
        out_shape=jax.ShapeDtypeStruct((Bp, D_out_p), jnp.float32),
        grid_spec=pltpu.PrefetchScalarGridSpec(
            num_scalar_prefetch=0,
            grid=grid,
            in_specs=in_specs,
            out_specs=pl.BlockSpec((BB, D_out_p), lambda i: (i, 0)),
        ),
        compiler_params=pltpu.CompilerParams(
            dimension_semantics=("parallel",),
            vmem_limit_bytes=vmem_limit,
        ),
        cost_estimate=cost,
    )(*args)

    return out[:B, :D_out].astype(x.dtype)


def init_params(key, dims):
    """Deterministic init mirroring torch.nn.Linear (weights pre-transposed)."""
    params = []
    for d_in, d_out in zip(dims[:-1], dims[1:]):
        key, kw, kb = jax.random.split(key, 3)
        bound = 1.0 / (d_in ** 0.5)
        w = jax.random.uniform(kw, (d_in, d_out), jnp.float32, -bound, bound)  # weight.T
        b = jax.random.uniform(kb, (1, d_out), jnp.float32, -bound, bound)     # bias
        params.append((w, b))
    return params


def reference_forward(x, params):
    """Pure-JAX f32 reference replicating the PyTorch MLP forward exactly."""
    h = x
    n = len(params)
    for i, (w, b) in enumerate(params):
        h = h @ w + b[0]
        if i < n - 1:
            h = jnp.maximum(h, 0.0)
    return h


if __name__ == "__main__":
    # MLP(dims=[32, 128, 64, 8]): Linear+ReLU, Linear+ReLU, Linear
    dims = (32, 128, 64, 8)
    B = 256                       # blocked into 2 grid steps of 128 rows

    key = jax.random.PRNGKey(0)
    kx, kp = jax.random.split(key)
    x = jax.random.normal(kx, (B, dims[0]), jnp.float32)
    params = init_params(kp, dims)

    ref = reference_forward(x, params)

    # f32 path: tight numerical check against the reference.
    out_f32 = jax.block_until_ready(mlp_forward(x, params, use_bf16_matmul=False))
    assert out_f32.shape == (B, dims[-1])
    np.testing.assert_allclose(np.asarray(out_f32), np.asarray(ref),
                               rtol=5e-4, atol=5e-4)

    # Default (bf16 MXU) path: looser tolerance vs. the f32 reference.
    out = jax.block_until_ready(mlp_forward(x, params))
    assert out.shape == (B, dims[-1])
    np.testing.assert_allclose(np.asarray(out), np.asarray(ref),
                               rtol=3e-2, atol=3e-2)

    print("KERNEL_OK")
</pallas_src>

<mosaic_0001>
module attributes {stable_mosaic.version = 11 : i64} {
  func.func @mlp_kernel(%arg0: i32, %arg1: memref<128x32xf32, #tpu.memory_space<vmem>>, %arg2: memref<32x128xf32, #tpu.memory_space<vmem>>, %arg3: memref<1x128xf32, #tpu.memory_space<vmem>>, %arg4: memref<128x64xf32, #tpu.memory_space<vmem>>, %arg5: memref<1x64xf32, #tpu.memory_space<vmem>>, %arg6: memref<64x128xf32, #tpu.memory_space<vmem>>, %arg7: memref<1x128xf32, #tpu.memory_space<vmem>>, %arg8: memref<128x128xf32, #tpu.memory_space<vmem>>) attributes {dimension_semantics = [#tpu.dimension_semantics<parallel>], iteration_bounds = array<i64: 2>, scalar_prefetch = 0 : i64, scratch_operands = 0 : i64, tpu.core_type = #tpu.core_type<tc>, window_params = [{transform_indices = @transform_0, window_bounds = array<i64: 128, 32>}, {pipeline_mode = #tpu.pipeline_mode<synchronous>, transform_indices = @transform_1, window_bounds = array<i64: 32, 128>}, {pipeline_mode = #tpu.pipeline_mode<synchronous>, transform_indices = @transform_2, window_bounds = array<i64: 1, 128>}, {pipeline_mode = #tpu.pipeline_mode<synchronous>, transform_indices = @transform_3, window_bounds = array<i64: 128, 64>}, {pipeline_mode = #tpu.pipeline_mode<synchronous>, transform_indices = @transform_4, window_bounds = array<i64: 1, 64>}, {pipeline_mode = #tpu.pipeline_mode<synchronous>, transform_indices = @transform_5, window_bounds = array<i64: 64, 128>}, {pipeline_mode = #tpu.pipeline_mode<synchronous>, transform_indices = @transform_6, window_bounds = array<i64: 1, 128>}, {transform_indices = @transform_7, window_bounds = array<i64: 128, 128>}]} {
    %c0 = arith.constant 0 : index
    %c0_0 = arith.constant 0 : index
    %0 = vector.load %arg1[%c0, %c0_0] : memref<128x32xf32, #tpu.memory_space<vmem>>, vector<128x32xf32>
    %c0_1 = arith.constant 0 : index
    %c0_2 = arith.constant 0 : index
    %1 = vector.load %arg2[%c0_1, %c0_2] : memref<32x128xf32, #tpu.memory_space<vmem>>, vector<32x128xf32>
    %c0_3 = arith.constant 0 : index
    %c0_4 = arith.constant 0 : index
    %2 = vector.load %arg3[%c0_3, %c0_4] : memref<1x128xf32, #tpu.memory_space<vmem>>, vector<1x128xf32>
    %cst = arith.constant dense<0.000000e+00> : vector<128x128xf32>
    %3 = tpu.matmul %0, %1, %cst {dimension_numbers = #tpu.dot_dimension_numbers<[1], [0], [0], [1], [0, 0, 1, 1], [], []>} : vector<128x32xf32>, vector<32x128xf32>, vector<128x128xf32> -> vector<128x128xf32>
    %4 = vector.broadcast %2 : vector<1x128xf32> to vector<128x128xf32>
    %5 = arith.addf %3, %4 : vector<128x128xf32>
    %cst_5 = arith.constant 0.000000e+00 : f32
    %6 = vector.broadcast %cst_5 : f32 to vector<128x128xf32>
    %7 = arith.maximumf %5, %6 : vector<128x128xf32>
    %c0_6 = arith.constant 0 : index
    %c0_7 = arith.constant 0 : index
    %8 = vector.load %arg4[%c0_6, %c0_7] : memref<128x64xf32, #tpu.memory_space<vmem>>, vector<128x64xf32>
    %c0_8 = arith.constant 0 : index
    %c0_9 = arith.constant 0 : index
    %9 = vector.load %arg5[%c0_8, %c0_9] : memref<1x64xf32, #tpu.memory_space<vmem>>, vector<1x64xf32>
    %cst_10 = arith.constant dense<0.000000e+00> : vector<128x64xf32>
    %10 = tpu.matmul %7, %8, %cst_10 {dimension_numbers = #tpu.dot_dimension_numbers<[1], [0], [0], [1], [0, 0, 1, 1], [], []>} : vector<128x128xf32>, vector<128x64xf32>, vector<128x64xf32> -> vector<128x64xf32>
    %11 = vector.broadcast %9 : vector<1x64xf32> to vector<128x64xf32>
    %12 = arith.addf %10, %11 : vector<128x64xf32>
    %cst_11 = arith.constant 0.000000e+00 : f32
    %13 = vector.broadcast %cst_11 : f32 to vector<128x64xf32>
    %14 = arith.maximumf %12, %13 : vector<128x64xf32>
    %c0_12 = arith.constant 0 : index
    %c0_13 = arith.constant 0 : index
    %15 = vector.load %arg6[%c0_12, %c0_13] : memref<64x128xf32, #tpu.memory_space<vmem>>, vector<64x128xf32>
    %c0_14 = arith.constant 0 : index
    %c0_15 = arith.constant 0 : index
    %16 = vector.load %arg7[%c0_14, %c0_15] : memref<1x128xf32, #tpu.memory_space<vmem>>, vector<1x128xf32>
    %cst_16 = arith.constant dense<0.000000e+00> : vector<128x128xf32>
    %17 = tpu.matmul %14, %15, %cst_16 {dimension_numbers = #tpu.dot_dimension_numbers<[1], [0], [0], [1], [0, 0, 1, 1], [], []>} : vector<128x64xf32>, vector<64x128xf32>, vector<128x128xf32> -> vector<128x128xf32>
    %18 = vector.broadcast %16 : vector<1x128xf32> to vector<128x128xf32>
    %19 = arith.addf %17, %18 : vector<128x128xf32>
    %c0_17 = arith.constant 0 : index
    %c0_18 = arith.constant 0 : index
    %20 = vector.load %arg8[%c0_17, %c0_18] : memref<128x128xf32, #tpu.memory_space<vmem>>, vector<128x128xf32>
    tpu.vector_store %arg8[%c0_17, %c0_18], %19 {strides = array<i32>} : memref<128x128xf32, #tpu.memory_space<vmem>>, vector<128x128xf32>,
    return
  }
  func.func @transform_0(%arg0: i32) -> (i32, i32) {
    %c0_i32 = arith.constant 0 : i32
    %c0_i32_0 = arith.constant 0 : i32
    return %arg0, %c0_i32 : i32, i32
  }
  func.func @transform_1(%arg0: i32) -> (i32, i32) {
    %c0_i32 = arith.constant 0 : i32
    %c0_i32_0 = arith.constant 0 : i32
    %c0_i32_1 = arith.constant 0 : i32
    return %c0_i32, %c0_i32_0 : i32, i32
  }
  func.func @transform_2(%arg0: i32) -> (i32, i32) {
    %c0_i32 = arith.constant 0 : i32
    %c0_i32_0 = arith.constant 0 : i32
    %c0_i32_1 = arith.constant 0 : i32
    return %c0_i32, %c0_i32_0 : i32, i32
  }
  func.func @transform_3(%arg0: i32) -> (i32, i32) {
    %c0_i32 = arith.constant 0 : i32
    %c0_i32_0 = arith.constant 0 : i32
    %c0_i32_1 = arith.constant 0 : i32
    return %c0_i32, %c0_i32_0 : i32, i32
  }
  func.func @transform_4(%arg0: i32) -> (i32, i32) {
    %c0_i32 = arith.constant 0 : i32
    %c0_i32_0 = arith.constant 0 : i32
    %c0_i32_1 = arith.constant 0 : i32
    return %c0_i32, %c0_i32_0 : i32, i32
  }
  func.func @transform_5(%arg0: i32) -> (i32, i32) {
    %c0_i32 = arith.constant 0 : i32
    %c0_i32_0 = arith.constant 0 : i32
    %c0_i32_1 = arith.constant 0 : i32
    return %c0_i32, %c0_i32_0 : i32, i32
  }
  func.func @transform_6(%arg0: i32) -> (i32, i32) {
    %c0_i32 = arith.constant 0 : i32
    %c0_i32_0 = arith.constant 0 : i32
    %c0_i32_1 = arith.constant 0 : i32
    return %c0_i32, %c0_i32_0 : i32, i32
  }
  func.func @transform_7(%arg0: i32) -> (i32, i32) {
    %c0_i32 = arith.constant 0 : i32
    %c0_i32_0 = arith.constant 0 : i32
    return %arg0, %c0_i32 : i32, i32
  }
}

</mosaic_0001>

<bundles_post_ra>
// kernel: tpu_custom_call.1
= control target key start
LH: loop header
LB: loop body
LE: loop exit
PB: predicated region body
PF: predicated region fallthrough
CT: control target
= control target key end

     0   :  { %12 = vsyncpa [#allocation3], 0  ;;  %s1752_s0 = inlined_call_operand.vmem [shape: f32[256,32], index: 0, kind: input, shape index: {}]   ;;  %s1753_s1 = inlined_call_operand.vmem [shape: f32[32,128], index: 1, kind: input, shape index: {}]   ;;  %s1754_s2 = inlined_call_operand.vmem [shape: f32[1,128], index: 2, kind: input, shape index: {}]   ;;  %s1755_s3 = inlined_call_operand.vmem [shape: f32[128,64], index: 3, kind: input, shape index: {}]   ;;  %s1756_s4 = inlined_call_operand.vmem [shape: f32[1,64], index: 4, kind: input, shape index: {}]   ;;  %s1757_s5 = inlined_call_operand.vmem [shape: f32[64,128], index: 5, kind: input, shape index: {}]   ;;  %s1758_s6 = inlined_call_operand.vmem [shape: f32[1,128], index: 6, kind: input, shape index: {}]   ;;  %s1759_s7 = inlined_call_operand.hbm [shape: f32[256,128], index: 7, kind: output, shape index: {}]  }
   0x1   :  { %14 = vsyncpa [#allocation3 + $0x1], 0  ;;  %s1466_s24 = smov 0   ;;  %s1468_s25 = smov 0  }
   0x2   :  { %s1470_s26 = smov 0   ;;  %s1472_s27 = smov 0  }
   0x3 LB: > { %s1487_s28 = sadd.s32 4294967295, %s1421_s27   ;;  %s1002_s29 = sadd.s32 4294967294, %s1421_s27   ;;  %s1421_s27 = sphi %s1472_s27, %s1765_s27   ;;  %s1417_s26 = sphi %s1470_s26, %s1764_s26   ;;  %s1413_s25 = sphi %s1468_s25, %s1763_s25   ;;  %s1409_s24 = sphi %s1466_s24, %s1762_s24  }
   0x4   : > { %s1491_s30 = sadd.s32 1, %s1421_s27   ;;  %s179_s8 = sadd.s32 1, %s1417_s26 }
   0x5   : > { %s176_s9 = ssub.s32 %s1421_s27, %s1491_s30  ;;  %p189_p0 = scmp.ne.s32.totalorder %s1417_s26, %s1413_s25 }
   0x6   : > { %p177_p1 = scmp.eq.s32.totalorder %s176_s9, 0  ;;  %p190_p2 = scmp.eq.s32.totalorder %s1487_s28, 1 }
   0x7   : > { %p195_p3 = scmp.ne.s32.totalorder %s1413_s25, %s1409_s24  ;;  %p196_p4 = scmp.eq.s32.totalorder %s1002_s29, 1 }
   0x8   : > { %s1502_s10 = scalar_select %p177_p1, %s1417_s26, %s179_s8  }
   0x9   : > { %p1504_p5 = por %p190_p2, %p189_p0  ;;  %p1508_p6 = por %p196_p4, %p195_p3 }
   0xa   : > { %p1005_p7 = scmp.ge.s32.totalorder %s1421_s27, 1  ;;  %p241_p8 = scmp.lt.s32.totalorder %s1421_s27, 3 }
   0xc   : > { %p242_p9 = pnand %p1005_p7, %p241_p8 }
   0xd   : > { %v296_v0 = vld [vmem:[%s1753_s1] sm:$0xff] (!%p242_p9)  ;;  %v297_v1 = vld [vmem:[%s1753_s1 + $0x8] sm:$0xff] (!%p242_p9)  ;;  %v298_v2 = vld [vmem:[%s1753_s1 + $0x10] sm:$0xff] (!%p242_p9)  ;;  %s1007_s19 = sshll.u32 (!%p242_p9), %s1487_s28, 4  ;;  %vm307_vm0 = vcmask (!%p242_p9), 261120   ;;  %vm716_vm1 = vcmask (!%p242_p9), 523264  }
   0xe   : > { %245 = sbr.rel (%p242_p9) target bundleno = 720 (0x2d0), region = 48  ;;  %v1254_v3 = vpack.c.bf16 (!%p242_p9), %v297_v1, %v296_v0  ;;  %v299_v4 = vld [vmem:[%s1753_s1 + $0x18] sm:$0xff] (!%p242_p9)  ;;  %p274_p10 = scmp.lt.s32.totalorder (!%p242_p9), %s1007_s19, 31  ;;  %v517_v5 = vld [vmem:[%s1755_s3] sm:$0xff] (!%p242_p9)  ;;  %v518_v6 = vld [vmem:[%s1755_s3 + $0x8] sm:$0xff] (!%p242_p9) }
   0xf   : > { %v1258_v7 = vpack.c.bf16 (!%p242_p9), %v299_v4, %v298_v2  ;;  %v1262_v8 = vpack.c.bf16 (!%p242_p9), %v518_v6, %v517_v5  ;;  %v519_v9 = vld [vmem:[%s1755_s3 + $0x10] sm:$0xff] (!%p242_p9)  ;;  %v520_v10 = vld [vmem:[%s1755_s3 + $0x18] sm:$0xff] (!%p242_p9)  ;;  %v521_v12 = vld [vmem:[%s1755_s3 + $0x20] sm:$0xff] (!%p242_p9)  ;;  %s270_s23 = sand.u32 (!%p242_p9), 1, %s1413_s25   ;;  %s1049_s14 = sshll.u32 (!%p242_p9), %s1487_s28, 11 }
  0x10   : > { %1255 = vmatprep.subr.bf16.mxu0 (!%p242_p9), %v1254_v3  ;;  %v1266_v11 = vpack.c.bf16 (!%p242_p9), %v520_v10, %v519_v9  ;;  %v522_v13 = vld [vmem:[%s1755_s3 + $0x28] sm:$0xff] (!%p242_p9)  ;;  %v523_v16 = vld [vmem:[%s1755_s3 + $0x30] sm:$0xff] (!%p242_p9)  ;;  %v524_v17 = vld [vmem:[%s1755_s3 + $0x38] sm:$0xff] (!%p242_p9)  ;;  %s1006_s8 = sshll.u32 (!%p242_p9), %s270_s23, 7  ;;  %s1703_s18 = scalar_lea.hbm (!%p242_p9), %s1759_s7, %s1049_s14 }
  0x11   : > { %1257 = vmatpush3.bf16.msra.mxu0 (!%p242_p9), %v1254_v3  ;;  %1263 = vmatprep.subr.bf16.mxu1 (!%p242_p9), %v1262_v8  ;;  %v1270_v14 = vpack.c.bf16 (!%p242_p9), %v522_v13, %v521_v12  ;;  %v1274_v20 = vpack.c.bf16 (!%p242_p9), %v524_v17, %v523_v16  ;;  %v525_v21 = vld [vmem:[%s1755_s3 + $0x40] sm:$0xff] (!%p242_p9)  ;;  %v526_v22 = vld [vmem:[%s1755_s3 + $0x48] sm:$0xff] (!%p242_p9)  ;;  %v527_v26 = vld [vmem:[%s1755_s3 + $0x50] sm:$0xff] (!%p242_p9)  ;;  %s1682_s13 = scalar_lea.vmem (!%p242_p9), [#allocation2], %s1006_s8  ;;  %s1711_s28 = scalar_lea.sflag (!%p242_p9), [#allocation3], %s270_s23 }
  0x12   : > { %1259 = vmatprep.subr.bf16.mxu0 (!%p242_p9), %v1258_v7  ;;  %1265 = vmatpush3.bf16.msra.mxu1 (!%p242_p9), %v1262_v8  ;;  %v1278_v25 = vpack.c.bf16 (!%p242_p9), %v526_v22, %v525_v21  ;;  %v528_v27 = vld [vmem:[%s1755_s3 + $0x58] sm:$0xff] (!%p242_p9)  ;;  %v529_v31 = vld [vmem:[%s1755_s3 + $0x60] sm:$0xff] (!%p242_p9)  ;;  %v530_v32 = vld [vmem:[%s1755_s3 + $0x68] sm:$0xff] (!%p242_p9)  ;;  %s940_s15 = sshll.u32 (!%p242_p9), %s1682_s13, 4  ;;  %s1705_s15 = int_to_ptr.vmem [resolvable:$true] %s940_s15 }
  0x13   : > { %1267 = vmatprep.subr.bf16.mxu1 (!%p242_p9), %v1266_v11  ;;  %v1282_v30 = vpack.c.bf16 (!%p242_p9), %v528_v27, %v527_v26  ;;  %v1286_v35 = vpack.c.bf16 (!%p242_p9), %v530_v32, %v529_v31  ;;  %v531_v43 = vld [vmem:[%s1755_s3 + $0x70] sm:$0xff] (!%p242_p9)  ;;  %v532_v44 = vld [vmem:[%s1755_s3 + $0x78] sm:$0xff] (!%p242_p9)  ;;  %v701_v46 = vld [vmem:[%s1757_s5] sm:$0xff] (!%p242_p9)  ;;  %s1359_s20 = scalar_lea.vmem (!%p242_p9), %s1705_s15, 2048 }
  0x14   : > { %v1290_v45 = vpack.c.bf16 (!%p242_p9), %v532_v44, %v531_v43  ;;  %v702_v47 = vld [vmem:[%s1757_s5 + $0x8] sm:$0xff] (!%p242_p9)  ;;  %v703_v48 = vld [vmem:[%s1757_s5 + $0x10] sm:$0xff] (!%p242_p9)  ;;  %v704_v50 = vld [vmem:[%s1757_s5 + $0x18] sm:$0xff] (!%p242_p9)  ;;  %p1360_p11 = scmp.ne.s32.totalorder (!%p242_p9), %s1705_s15, %s1359_s20 }
  0x15   : > { %s1767_s19 = smov (!%p274_p10, %s1007_s19), 31  ;;  %1261 = vmatpush3.bf16.msra.mxu0 %v1258_v7  ;;  %v1294_v49 = vpack.c.bf16 %v702_v47, %v701_v46  ;;  %v1298_v51 = vpack.c.bf16 %v704_v50, %v703_v48  ;;  %v705_v52 = vld [vmem:[%s1757_s5 + $0x20] sm:$0xff]  ;;  %v706_v53 = vld [vmem:[%s1757_s5 + $0x28] sm:$0xff] }
  0x16   : > { %s1008_s21 = sshll.u32 %s1767_s19, 3  ;;  %1269 = vmatpush3.bf16.msra.mxu1 %v1266_v11  ;;  %v1302_v54 = vpack.c.bf16 %v706_v53, %v705_v52  ;;  %v1633_v55 = vld [vmem:[%s1754_s2] ss:$0 sm:$0xff]  ;;  %p1361_p12 = pnand %p1360_p11, %p1504_p5 }
  0x17   : > { %s1548_s29 = scalar_lea.vmem %s1752_s0, %s1008_s21  ;;  %1271 = vmatprep.subr.bf16.mxu1 %v1270_v14  ;;  %1295 = vmatprep.subr.bf16.mxu0 %v1294_v49  ;;  %v1026_v43 = vld [vmem:[%s1756_s4] ss:$0 sm:$0xff]  ;;  %s1423_s21 = smov [#allocation2]  }
  0x18   : > { %v280_v15 = vld [vmem:[%s1548_s29] sm:$0xff]  ;;  %v281_v18 = vld [vmem:[%s1548_s29 + $0x8] sm:$0xff]  ;;  %v282_v19 = vld [vmem:[%s1548_s29 + $0x10] sm:$0xff]  ;;  %p1362_p13 = pneg %p1361_p12 }
  0x19   : > { %1134 = vmatprep.mubr.msk.f32.mxu0 %vm307_vm0, %v280_v15  ;;  %v283_v23 = vld [vmem:[%s1548_s29 + $0x18] sm:$0xff]  ;;  %v284_v24 = vld [vmem:[%s1548_s29 + $0x20] sm:$0xff]  ;;  %v285_v28 = vld [vmem:[%s1548_s29 + $0x28] sm:$0xff] }
  0x1a   : > { %1135 = vmatmul.mubr.msk.f32.vlgmr.msra.gmra.mrb[0].mxu0 %vm307_vm0, %v281_v18  ;;  %1273 = vmatpush3.bf16.msra.mxu1 %v1270_v14  ;;  %v286_v29 = vld [vmem:[%s1548_s29 + $0x30] sm:$0xff]  ;;  %v287_v33 = vld [vmem:[%s1548_s29 + $0x38] sm:$0xff]  ;;  %v288_v34 = vld [vmem:[%s1548_s29 + $0x40] sm:$0xff] }
  0x1b   : > { %1137 = vmatprep.mubr.msk.f32.mxu0 %vm307_vm0, %v282_v19  ;;  %1275 = vmatprep.subr.bf16.mxu1 %v1274_v20  ;;  %v289_v36 = vld [vmem:[%s1548_s29 + $0x48] sm:$0xff]  ;;  %v290_v37 = vld [vmem:[%s1548_s29 + $0x50] sm:$0xff]  ;;  %v291_v38 = vld [vmem:[%s1548_s29 + $0x58] sm:$0xff] }
  0x1c   : > { %v292_v39 = vld [vmem:[%s1548_s29 + $0x60] sm:$0xff]  ;;  %v293_v40 = vld [vmem:[%s1548_s29 + $0x68] sm:$0xff]  ;;  %v294_v41 = vld [vmem:[%s1548_s29 + $0x70] sm:$0xff]  ;;  %1297 = vmatpush3.bf16.msra.mxu0 %v1294_v49 }
  0x1d   : > { %v295_v42 = vld [vmem:[%s1548_s29 + $0x78] sm:$0xff]  ;;  %1299 = vmatprep.subr.bf16.mxu0 %v1298_v51  ;;  %s1363_s29 = sshll.u32 %s1423_s21, 4  ;;  %s1364_s29 = int_to_ptr.vmem [resolvable:$false] %s1363_s29 }
  0x1e   : > { %1138 = vmatmul.mubr.msk.f32.gmra.mrb[2].mxu0 %vm307_vm0, %v283_v23  ;;  %1277 = vmatpush3.bf16.msra.mxu1 %v1274_v20  ;;  %s1365_s22 = scalar_lea.vmem %s1364_s29, 4096  ;;  %p1366_p0 = scmp.lt.s32.totalorder %s1705_s15, %s1364_s29 }
  0x1f   : > { %1140 = vmatprep.mubr.msk.f32.mxu0 %vm307_vm0, %v284_v24  ;;  %1279 = vmatprep.subr.bf16.mxu1 %v1278_v25  ;;  %p1367_p1 = scmp.lt.s32.totalorder %s1365_s22, %s1359_s20 }
  0x20   : > { %1301 = vmatpush3.bf16.msra.mxu0 %v1298_v51 }
  0x21   : > { %1303 = vmatprep.subr.bf16.mxu0 %v1302_v54  ;;  %p1368_p2 = por %p1367_p1, %p1366_p0 }
  0x22   : > { %1141 = vmatmul.mubr.msk.f32.gmra.mrb[4].mxu0 %vm307_vm0, %v285_v28  ;;  %1281 = vmatpush3.bf16.msra.mxu1 %v1278_v25 }
  0x23   : > { %1143 = vmatprep.mubr.msk.f32.mxu0 %vm307_vm0, %v286_v29  ;;  %1283 = vmatprep.subr.bf16.mxu1 %v1282_v30  ;;  %p1369_p3 = pnand %p1368_p2, %p1362_p13 }
  0x24   : > { %1305 = vmatpush3.bf16.msra.mxu0 %v1302_v54 }
  0x26   : > { %1144 = vmatmul.mubr.msk.f32.gmra.mrb[6].mxu0 %vm307_vm0, %v287_v33  ;;  %1285 = vmatpush3.bf16.msra.mxu1 %v1282_v30 }
  0x27   : > { %1146 = vmatprep.mubr.msk.f32.mxu0 %vm307_vm0, %v288_v34  ;;  %1287 = vmatprep.subr.bf16.mxu1 %v1286_v35 }
  0x2a   : > { %1147 = vmatmul.mubr.msk.f32.gmra.mrb[8].mxu0 %vm307_vm0, %v289_v36  ;;  %1289 = vmatpush3.bf16.msra.mxu1 %v1286_v35 }
  0x2b   : > { %1149 = vmatprep.mubr.msk.f32.mxu0 %vm307_vm0, %v290_v37  ;;  %1291 = vmatprep.subr.bf16.mxu1 %v1290_v45 }
  0x2e   : > { %1150 = vmatmul.mubr.msk.f32.gmra.mrb[10].mxu0 %vm307_vm0, %v291_v38  ;;  %1293 = vmatpush3.bf16.msra.mxu1 %v1290_v45 }
  0x2f   : > { %1152 = vmatprep.mubr.msk.f32.mxu0 %vm307_vm0, %v292_v39  ;;  %1310 = vmatprep.subr.bf16.mxu1 %v1294_v49 }
  0x32   : > { %1153 = vmatmul.mubr.msk.f32.gmra.mrb[12].mxu0 %vm307_vm0, %v293_v40  ;;  %v707_v40 = vld [vmem:[%s1757_s5 + $0x30] sm:$0xff] }
  0x33   : > { %1155 = vmatprep.mubr.msk.f32.mxu0 %vm307_vm0, %v294_v41  ;;  %v708_v41 = vld [vmem:[%s1757_s5 + $0x38] sm:$0xff] }
  0x36   : > { %1156 = vmatmul.mubr.msk.f32.gmra.mrb[14].mxu0 %vm307_vm0, %v295_v42  ;;  %v1306_v42 = vpack.c.bf16 %v708_v41, %v707_v40 }
  0x38   : > { %1307 = vmatprep.subr.bf16.mxu0 %v1306_v42 }
  0x39   : > { %1309 = vmatpush3.bf16.msra.mxu0 %v1306_v42 }
  0xed   : > { %v1136_v56 = vpop.f32.mrb[0].mxu0 }
  0xee   : > { %v428_v57 = vadd.f32 %v1136_v56, %v1633_v55  ;;  %v422_v58 = vpop.f32.mrb[1].mxu0 }
  0xef   : > { %v423_v59 = vadd.f32 %v1633_v55, %v422_v58 }
  0xf0   : > { %v502_v62 = vmax.f32 %v428_v57, 0.0 }
  0xf1   : > { %v1139_v60 = vpop.f32.mrb[2].mxu0  ;;  %v501_v61 = vmax.f32 %v423_v59, 0.0 }
  0xf2   : > { %v438_v63 = vadd.f32 %v1139_v60, %v1633_v55  ;;  %v432_v0 = vpop.f32.mrb[3].mxu0 }
  0xf3   : > { %v433_v1 = vadd.f32 %v1633_v55, %v432_v0  ;;  %1190 = vmatprep.mubr.f32.mxu1 %v501_v61 }
  0xf4   : > { %1191 = vmatmul.mubr.f32.vlgmr.msra.gmra.mrb[0].mxu1 %v502_v62  ;;  %v504_v4 = vmax.f32 %v438_v63, 0.0 }
  0xf5   : > { %v503_v2 = vmax.f32 %v433_v1, 0.0  ;;  %v1142_v3 = vpop.f32.mrb[4].mxu0  ;;  %1314 = vmatpush3.bf16.msra.mxu1 %v1294_v49 }
  0xf6   : > { %v448_v5 = vadd.f32 %v1142_v3, %v1633_v55  ;;  %v442_v6 = vpop.f32.mrb[5].mxu0  ;;  %1311 = vmatprep.subr.bf16.mxu1 %v1298_v51 }
  0xf7   : > { %v443_v7 = vadd.f32 %v1633_v55, %v442_v6  ;;  %1193 = vmatprep.mubr.f32.mxu1 %v503_v2 }
  0xf8   : > { %1194 = vmatmul.mubr.f32.gmra.mrb[2].mxu1 %v504_v4  ;;  %v506_v10 = vmax.f32 %v448_v5, 0.0 }
  0xf9   : > { %v505_v8 = vmax.f32 %v443_v7, 0.0  ;;  %v1145_v9 = vpop.f32.mrb[6].mxu0  ;;  %1315 = vmatpush3.bf16.msra.mxu1 %v1298_v51 }
  0xfa   : > { %v458_v11 = vadd.f32 %v1145_v9, %v1633_v55  ;;  %v452_v12 = vpop.f32.mrb[7].mxu0  ;;  %1312 = vmatprep.subr.bf16.mxu1 %v1302_v54 }
  0xfb   : > { %v453_v13 = vadd.f32 %v1633_v55, %v452_v12  ;;  %1196 = vmatprep.mubr.f32.mxu1 %v505_v8 }
  0xfc   : > { %1197 = vmatmul.mubr.f32.gmra.mrb[4].mxu1 %v506_v10  ;;  %v508_v16 = vmax.f32 %v458_v11, 0.0 }
  0xfd   : > { %v507_v14 = vmax.f32 %v453_v13, 0.0  ;;  %v1148_v15 = vpop.f32.mrb[8].mxu0  ;;  %1316 = vmatpush3.bf16.msra.mxu1 %v1302_v54 }
  0xfe   : > { %v468_v17 = vadd.f32 %v1148_v15, %v1633_v55  ;;  %v462_v18 = vpop.f32.mrb[9].mxu0  ;;  %1313 = vmatprep.subr.bf16.mxu1 %v1306_v42 }
  0xff   : > { %v463_v19 = vadd.f32 %v1633_v55, %v462_v18  ;;  %1199 = vmatprep.mubr.f32.mxu1 %v507_v14 }
 0x100   : > { %1200 = vmatmul.mubr.f32.gmra.mrb[6].mxu1 %v508_v16  ;;  %v510_v22 = vmax.f32 %v468_v17, 0.0 }
 0x101   : > { %v509_v20 = vmax.f32 %v463_v19, 0.0  ;;  %v1151_v21 = vpop.f32.mrb[10].mxu0  ;;  %1317 = vmatpush3.bf16.msra.mxu1 %v1306_v42 }
 0x102   : > { %v478_v23 = vadd.f32 %v1151_v21, %v1633_v55  ;;  %v472_v24 = vpop.f32.mrb[11].mxu0 }
 0x103   : > { %v473_v25 = vadd.f32 %v1633_v55, %v472_v24  ;;  %1202 = vmatprep.mubr.f32.mxu1 %v509_v20 }
 0x104   : > { %1203 = vmatmul.mubr.f32.gmra.mrb[8].mxu1 %v510_v22  ;;  %v512_v28 = vmax.f32 %v478_v23, 0.0 }
 0x105   : > { %v511_v26 = vmax.f32 %v473_v25, 0.0  ;;  %v1154_v27 = vpop.f32.mrb[12].mxu0 }
 0x106   : > { %v488_v29 = vadd.f32 %v1154_v27, %v1633_v55  ;;  %v482_v30 = vpop.f32.mrb[13].mxu0 }
 0x107   : > { %v483_v31 = vadd.f32 %v1633_v55, %v482_v30  ;;  %1205 = vmatprep.mubr.f32.mxu1 %v511_v26 }
 0x108   : > { %1206 = vmatmul.mubr.f32.gmra.mrb[10].mxu1 %v512_v28  ;;  %v514_v34 = vmax.f32 %v488_v29, 0.0  ;;  %v1027_v28 = vld [vmem:[%s1758_s6] ss:$0 sm:$0xff] }
 0x109   : > { %v513_v32 = vmax.f32 %v483_v31, 0.0  ;;  %v1157_v33 = vpop.f32.mrb[14].mxu0 }
 0x10a   : > { %v498_v35 = vadd.f32 %v1157_v33, %v1633_v55  ;;  %v492_v36 = vpop.f32.mrb[15].mxu0 }
 0x10b   : > { %v493_v37 = vadd.f32 %v1633_v55, %v492_v36  ;;  %1208 = vmatprep.mubr.f32.mxu1 %v513_v32 }
 0x10c   : > { %1209 = vmatmul.mubr.f32.gmra.mrb[12].mxu1 %v514_v34  ;;  %v516_v39 = vmax.f32 %v498_v35, 0.0 }
 0x10d   : > { %v515_v38 = vmax.f32 %v493_v37, 0.0 }
 0x10f   : > { %1211 = vmatprep.mubr.f32.mxu1 %v515_v38 }
 0x110   : > { %1212 = vmatmul.mubr.f32.gmra.mrb[14].mxu1 %v516_v39 }
 0x1c7   : > { %v1192_v44 = vpop.f32.mrb[0].mxu1 }
 0x1c8   : > { %v612_v45 = vadd.f32 %v1192_v44, %v1026_v43  ;;  %v606_v46 = vpop.f32.mrb[1].mxu1 }
 0x1c9   : > { %v607_v47 = vadd.f32 %v1026_v43, %v606_v46 }
 0x1ca   : > { %v686_v50 = vmax.f32 %v612_v45, 0.0 }
 0x1cb   : > { %v685_v48 = vmax.f32 %v607_v47, 0.0  ;;  %v1195_v49 = vpop.f32.mrb[2].mxu1 }
 0x1cc   : > { %v622_v51 = vadd.f32 %v1195_v49, %v1026_v43  ;;  %v616_v52 = vpop.f32.mrb[3].mxu1 }
 0x1cd   : > { %v617_v53 = vadd.f32 %v1026_v43, %v616_v52  ;;  %1230 = vmatprep.mubr.msk.f32.mxu0 %vm716_vm1, %v685_v48 }
 0x1ce   : > { %1231 = vmatmul.mubr.msk.f32.vlgmr.msra.gmra.mrb[16].mxu0 %vm716_vm1, %v686_v50  ;;  %v688_v56 = vmax.f32 %v622_v51, 0.0 }
 0x1cf   : > { %v687_v54 = vmax.f32 %v617_v53, 0.0  ;;  %v1198_v55 = vpop.f32.mrb[4].mxu1 }
 0x1d0   : > { %v632_v57 = vadd.f32 %v1198_v55, %v1026_v43  ;;  %v626_v58 = vpop.f32.mrb[5].mxu1 }
 0x1d1   : > { %v627_v59 = vadd.f32 %v1026_v43, %v626_v58  ;;  %1233 = vmatprep.mubr.msk.f32.mxu0 %vm716_vm1, %v687_v54 }
 0x1d2   : > { %1234 = vmatmul.mubr.msk.f32.gmra.mrb[18].mxu0 %vm716_vm1, %v688_v56  ;;  %v690_v62 = vmax.f32 %v632_v57, 0.0 }
 0x1d3   : > { %v689_v60 = vmax.f32 %v627_v59, 0.0  ;;  %v1201_v61 = vpop.f32.mrb[6].mxu1 }
 0x1d4   : > { %v642_v63 = vadd.f32 %v1201_v61, %v1026_v43  ;;  %v636_v0 = vpop.f32.mrb[7].mxu1 }
 0x1d5   : > { %v637_v1 = vadd.f32 %v1026_v43, %v636_v0  ;;  %1236 = vmatprep.mubr.msk.f32.mxu0 %vm716_vm1, %v689_v60 }
 0x1d6   : > { %1237 = vmatmul.mubr.msk.f32.gmra.mrb[20].mxu0 %vm716_vm1, %v690_v62  ;;  %v692_v4 = vmax.f32 %v642_v63, 0.0 }
 0x1d7   : > { %v691_v2 = vmax.f32 %v637_v1, 0.0  ;;  %v1204_v3 = vpop.f32.mrb[8].mxu1 }
 0x1d8   : > { %v652_v5 = vadd.f32 %v1204_v3, %v1026_v43  ;;  %v646_v6 = vpop.f32.mrb[9].mxu1 }
 0x1d9   : > { %v647_v7 = vadd.f32 %v1026_v43, %v646_v6  ;;  %1239 = vmatprep.mubr.msk.f32.mxu0 %vm716_vm1, %v691_v2 }
 0x1da   : > { %1240 = vmatmul.mubr.msk.f32.gmra.mrb[22].mxu0 %vm716_vm1, %v692_v4  ;;  %v694_v10 = vmax.f32 %v652_v5, 0.0 }
 0x1db   : > { %v693_v8 = vmax.f32 %v647_v7, 0.0  ;;  %v1207_v9 = vpop.f32.mrb[10].mxu1 }
 0x1dc   : > { %v662_v11 = vadd.f32 %v1207_v9, %v1026_v43  ;;  %v656_v12 = vpop.f32.mrb[11].mxu1 }
 0x1dd   : > { %v657_v13 = vadd.f32 %v1026_v43, %v656_v12  ;;  %1242 = vmatprep.mubr.msk.f32.mxu0 %vm716_vm1, %v693_v8 }
 0x1de   : > { %1243 = vmatmul.mubr.msk.f32.gmra.mrb[24].mxu0 %vm716_vm1, %v694_v10  ;;  %v696_v16 = vmax.f32 %v662_v11, 0.0 }
 0x1df   : > { %v695_v14 = vmax.f32 %v657_v13, 0.0  ;;  %v1210_v15 = vpop.f32.mrb[12].mxu1 }
 0x1e0   : > { %v672_v17 = vadd.f32 %v1210_v15, %v1026_v43  ;;  %v666_v18 = vpop.f32.mrb[13].mxu1 }
 0x1e1   : > { %v667_v19 = vadd.f32 %v1026_v43, %v666_v18  ;;  %1245 = vmatprep.mubr.msk.f32.mxu0 %vm716_vm1, %v695_v14 }
 0x1e2   : > { %1246 = vmatmul.mubr.msk.f32.gmra.mrb[26].mxu0 %vm716_vm1, %v696_v16  ;;  %v698_v22 = vmax.f32 %v672_v17, 0.0 }
 0x1e3   : > { %v697_v20 = vmax.f32 %v667_v19, 0.0  ;;  %v1213_v21 = vpop.f32.mrb[14].mxu1 }
 0x1e4   : > { %v682_v23 = vadd.f32 %v1213_v21, %v1026_v43  ;;  %v676_v24 = vpop.f32.mrb[15].mxu1 }
 0x1e5   : > { %v677_v25 = vadd.f32 %v1026_v43, %v676_v24  ;;  %1248 = vmatprep.mubr.msk.f32.mxu0 %vm716_vm1, %v697_v20 }
 0x1e6   : > { %1249 = vmatmul.mubr.msk.f32.gmra.mrb[28].mxu0 %vm716_vm1, %v698_v22  ;;  %v700_v27 = vmax.f32 %v682_v23, 0.0 }
 0x1e7   : > { %v699_v26 = vmax.f32 %v677_v25, 0.0 }
 0x1e9   : > { %1251 = vmatprep.mubr.msk.f32.mxu1 %vm716_vm1, %v699_v26 }
 0x1ea   : > { %1252 = vmatmul.mubr.msk.f32.vlgmr.msra.gmra.mrb[16].mxu1 %vm716_vm1, %v700_v27 }
 0x2a1   : > { %v1232_v29 = vpop.f32.mrb[16].mxu0 }
 0x2a2   : > { %v837_v30 = vadd.f32 %v1232_v29, %v1027_v28  ;;  %v831_v31 = vpop.f32.mrb[17].mxu0 }
 0x2a3   : > { %v832_v32 = vadd.f32 %v1027_v28, %v831_v31 }
 0x2a4   : > { %911 = vst [vmem:[%s1682_s13 + $0x8] sm:$0xff] %v837_v30 }
 0x2a5   : > { %910 = vst [vmem:[%s1682_s13] sm:$0xff] %v832_v32  ;;  %v1235_v33 = vpop.f32.mrb[18].mxu0 }
 0x2a6   : > { %v847_v34 = vadd.f32 %v1235_v33, %v1027_v28  ;;  %v841_v35 = vpop.f32.mrb[19].mxu0 }
 0x2a7   : > { %v842_v36 = vadd.f32 %v1027_v28, %v841_v35 }
 0x2a8   : > { %913 = vst [vmem:[%s1682_s13 + $0x18] sm:$0xff] %v847_v34 }
 0x2a9   : > { %912 = vst [vmem:[%s1682_s13 + $0x10] sm:$0xff] %v842_v36  ;;  %v1238_v37 = vpop.f32.mrb[20].mxu0 }
 0x2aa   : > { %v857_v38 = vadd.f32 %v1238_v37, %v1027_v28  ;;  %v851_v39 = vpop.f32.mrb[21].mxu0 }
 0x2ab   : > { %v852_v40 = vadd.f32 %v1027_v28, %v851_v39 }
 0x2ac   : > { %915 = vst [vmem:[%s1682_s13 + $0x28] sm:$0xff] %v857_v38 }
 0x2ad   : > { %914 = vst [vmem:[%s1682_s13 + $0x20] sm:$0xff] %v852_v40  ;;  %v1241_v41 = vpop.f32.mrb[22].mxu0 }
 0x2ae   : > { %v867_v42 = vadd.f32 %v1241_v41, %v1027_v28  ;;  %v861_v43 = vpop.f32.mrb[23].mxu0 }
 0x2af   : > { %v862_v44 = vadd.f32 %v1027_v28, %v861_v43 }
 0x2b0   : > { %917 = vst [vmem:[%s1682_s13 + $0x38] sm:$0xff] %v867_v42 }
 0x2b1   : > { %916 = vst [vmem:[%s1682_s13 + $0x30] sm:$0xff] %v862_v44  ;;  %v1244_v45 = vpop.f32.mrb[24].mxu0 }
 0x2b2   : > { %v877_v46 = vadd.f32 %v1244_v45, %v1027_v28  ;;  %v871_v47 = vpop.f32.mrb[25].mxu0 }
 0x2b3   : > { %v872_v48 = vadd.f32 %v1027_v28, %v871_v47 }
 0x2b4   : > { %919 = vst [vmem:[%s1682_s13 + $0x48] sm:$0xff] %v877_v46 }
 0x2b5   : > { %918 = vst [vmem:[%s1682_s13 + $0x40] sm:$0xff] %v872_v48  ;;  %v1247_v49 = vpop.f32.mrb[26].mxu0 }
 0x2b6   : > { %v887_v50 = vadd.f32 %v1247_v49, %v1027_v28  ;;  %v881_v51 = vpop.f32.mrb[27].mxu0 }
 0x2b7   : > { %v882_v52 = vadd.f32 %v1027_v28, %v881_v51 }
 0x2b8   : > { %921 = vst [vmem:[%s1682_s13 + $0x58] sm:$0xff] %v887_v50 }
 0x2b9   : > { %920 = vst [vmem:[%s1682_s13 + $0x50] sm:$0xff] %v882_v52  ;;  %v1250_v53 = vpop.f32.mrb[28].mxu0 }
 0x2ba   : > { %v897_v54 = vadd.f32 %v1250_v53, %v1027_v28  ;;  %v891_v55 = vpop.f32.mrb[29].mxu0 }
 0x2bb   : > { %v892_v56 = vadd.f32 %v1027_v28, %v891_v55 }
 0x2bc   : > { %923 = vst [vmem:[%s1682_s13 + $0x68] sm:$0xff] %v897_v54 }
 0x2bd   : > { %922 = vst [vmem:[%s1682_s13 + $0x60] sm:$0xff] %v892_v56  ;;  %v1253_v57 = vpop.f32.mrb[16].mxu1 }
 0x2be   : > { %v907_v58 = vadd.f32 %v1253_v57, %v1027_v28  ;;  %v901_v59 = vpop.f32.mrb[17].mxu1 }
 0x2bf   : > { %v902_v60 = vadd.f32 %v1027_v28, %v901_v59 }
 0x2c0   : > { %925 = vst [vmem:[%s1682_s13 + $0x78] sm:$0xff] %v907_v58 }
 0x2c1   : > { %924 = vst [vmem:[%s1682_s13 + $0x70] sm:$0xff] %v902_v60 }
 0x2c2   : > { %1372 = shalt.err (!%p1369_p3)
}
 0x2c3   : > { %s1373_s23 = scalar_lea.hbm %s1703_s18, 2048  ;;  %s1377_s19 = scalar_lea.hbm %s1759_s7, 4096 }
 0x2c4   : > { %p1374_p4 = scmp.ne.s32.totalorder %s1703_s18, %s1373_s23  ;;  %p1378_p9 = scmp.lt.u32.totalorder %s1703_s18, %s1759_s7 }
 0x2c5   : > { %p1379_p10 = scmp.lt.u32.totalorder %s1377_s19, %s1373_s23  ;;  %p1381_p12 = scmp.lt.u32.totalorder %s1373_s23, %s1703_s18 }
 0x2c6   : > { %p1375_p7 = pnand %p1374_p4, %p1504_p5 }
 0x2c7   : > { %p1380_p11 = por %p1379_p10, %p1378_p9 }
 0x2c8   : > { %p1376_p8 = pneg %p1375_p7 }
 0x2c9   : > { %p1382_p13 = por %p1381_p12, %p1380_p11 }
 0x2cb   : > { %p1383_p0 = pnand %p1382_p13, %p1376_p8 }
 0x2cd   : > { %1386 = shalt.err (!%p1383_p0)
}
 0x2ce   : > { %s1424_s16 = smov 128   ;;  %s1425_s17 = smov 8  }
 0x2cf   : > { %1318 = dma.vmem_to_hbm [thread:$0]  (%p1504_p5), %s1705_s15, 2048, %s1703_s18, %s1711_s28, %s1424_s16, %s1424_s16, %s1425_s17  }
 0x2d0 PF: > { %p1324_p1 = scmp.ge.s32.totalorder %s1421_s27, 2  ;;  %s955_s20 = sand.u32 1, %s1409_s24  }
 0x2d1   : > { %s956_s21 = scalar_lea.sflag [#allocation3], %s955_s20 }
 0x2d2   : > { %p1321_p2 = pnand %p1324_p1, %p1508_p6 }
 0x2d4   : > { %1404 = dma.done.wait (!%p1321_p2), %s956_s21, 2048  }
 0x2d5   : > { %1406 = vsyncadd (!%p1321_p2), %s956_s21, 4294965248  ;;  %p17_p3 = scmp.ge.s32.totalorder %s1491_s30, 4   ;;  %s1762_s24 = smov %s1413_s25 }
 0x2d6   : > { %s1763_s25 = smov %s1417_s26  ;;  %s1764_s26 = smov %s1502_s10 }
 0x2d7   : > { %s1765_s27 = smov %s1491_s30  ;;  %19 = sbr.rel (!%p17_p3) target bundleno = 3 (0x3), region = 83 }
 0x2de   :  { %961 = vsyncpa [#allocation3], 1 }
 0x2df   :  { %963 = vsyncpa [#allocation3 + $0x1], 1 }

</bundles_post_ra>
